<compile_context>
chip_gen: v5e
topology: v5e:2x2
jax: 0.10.0
libtpu: 0.0.40
codegen_flags: <defaults>
</compile_context>

<pallas_src>
import functools

import jax
import jax.numpy as jnp
from jax.experimental import pallas as pl
from jax.experimental.pallas import tpu as pltpu


def _scale_pred_kernel(x_ref, w1_ref, b1_ref, w2_ref, b2_ref, o_ref, *,
                       act_dtype):
    # Channel-major / pixels-on-lanes layout:
    #   x_ref : (C1,  tn)   f32 activations for one (batch, pixel-tile)
    #   w1_ref: (C2h, C1)   bf16 conv1 weight with BN1 scale folded in
    #   b1_ref: (C2h, 1)    f32 folded BN1 bias
    #   w2_ref: (Cout, C2h) bf16 conv2 weight with BN2 scale folded in
    #   b2_ref: (Cout, 1)   f32 folded BN2 bias
    #   o_ref : (Cout, tn)  lane-dense (tn is a multiple of 128)
    x = x_ref[...].astype(jnp.bfloat16)

    # Conv1 (1x1) + folded BN + SiLU.  bf16 MXU matmul, f32 accumulation;
    # bias-add + SiLU in `act_dtype` (bf16 on v6e/v7x, f32 on v5e).
    h = jnp.dot(w1_ref[...], x, preferred_element_type=jnp.float32)
    h = (h + b1_ref[...]).astype(act_dtype)
    h = h * jax.nn.sigmoid(h)                         # SiLU (EUP)

    # Conv2 (1x1) + folded BN (no activation).
    y = jnp.dot(w2_ref[...], h.astype(jnp.bfloat16),
                preferred_element_type=jnp.float32)
    y = y + b2_ref[...]

    o_ref[...] = y.astype(o_ref.dtype)


def _device_defaults():
    """Per-generation defaults: SiLU dtype and VMEM budget."""
    try:
        kind = jax.devices()[0].device_kind.lower()
    except Exception:
        kind = ""
    pre_v6 = any(t in kind for t in ("v2", "v3", "v4", "v5"))
    is_v7 = "v7" in kind
    act_dtype = jnp.float32 if pre_v6 else jnp.bfloat16   # no bf16 VPU/EUP < v6
    # v7x: 64 MiB physical VMEM per TC -> leave headroom for compiler scratch.
    vmem_limit_bytes = (48 if is_v7 else 96) * 1024 * 1024
    return act_dtype, vmem_limit_bytes


def scale_prediction(x_nchw, params, num_classes, anchors_per_scale=3,
                     tn=1024, vmem_limit_bytes=None, act_dtype=None,
                     out_dtype=jnp.float32):
    """x_nchw: (B, C_in, H, W) float32 (NCHW, exactly as in PyTorch).
    Returns (B, anchors_per_scale, H, W, num_classes + 5)."""
    B, C1, H, W = x_nchw.shape
    w1, b1, w2, b2 = params
    C2h = w1.shape[0]
    Cout = w2.shape[0]
    assert Cout == anchors_per_scale * (num_classes + 5)

    d_act, d_vmem = _device_defaults()
    if act_dtype is None:
        act_dtype = d_act
    if vmem_limit_bytes is None:
        vmem_limit_bytes = d_vmem

    HW = H * W
    # Pixel tile = lane axis of both input and output.  Keep it a multiple of
    # 128 (unmasked vst) and <= HW; the last grid step may be a partial block
    # (no padding / slicing -> no extra HBM pass).  Sweep tn (512-2048) for
    # large feature maps.
    if HW >= 128:
        tn = max(128, (min(tn, HW) // 128) * 128)
    else:
        tn = HW                      # block == full array extent
    # Keep >= 2 parallel grid points so both v7x TCs / v6e megacore halves get
    # work even for small heads at B=1.
    while B * pl.cdiv(HW, tn) < 2 and tn > 128:
        tn = max(128, ((tn // 2 + 127) // 128) * 128)

    # NCHW -> (B, C1, H*W): a pure reshape, no transpose / extra HBM pass.
    x_mat = x_nchw.reshape(B, C1, HW)
    grid = (B, pl.cdiv(HW, tn))

    kernel = functools.partial(_scale_pred_kernel, act_dtype=act_dtype)

    def build_in_specs(weight_kwargs):
        return [
            # Activations: double-buffered, pipelined over the pixel-tile axis.
            # TODO(synk): if xprof shows exposed input DMA on v7x, try
            # pipeline_mode=pl.Buffered(3) on this spec only.
            pl.BlockSpec((None, C1, tn), lambda b, j: (b, 0, j)),
            # Weights / biases are grid-invariant (constant index_map): the
            # pipeline fetches them once; single-buffer them to halve their
            # VMEM footprint.
            pl.BlockSpec((C2h, C1), lambda b, j: (0, 0), **weight_kwargs),
            pl.BlockSpec((C2h, 1), lambda b, j: (0, 0), **weight_kwargs),
            pl.BlockSpec((Cout, C2h), lambda b, j: (0, 0), **weight_kwargs),
            pl.BlockSpec((Cout, 1), lambda b, j: (0, 0), **weight_kwargs),
        ]

    def run(weight_kwargs):
        f = pl.pallas_call(
            kernel,
            out_shape=jax.ShapeDtypeStruct((B, Cout, HW), out_dtype),
            grid=grid,
            in_specs=build_in_specs(weight_kwargs),
            out_specs=pl.BlockSpec((None, Cout, tn), lambda b, j: (b, 0, j)),
            compiler_params=pltpu.CompilerParams(
                dimension_semantics=("parallel", "parallel"),
                vmem_limit_bytes=vmem_limit_bytes),
        )
        return f(x_mat, w1, b1, w2, b2)

    try:
        out_mat = jax.block_until_ready(run(dict(pipeline_mode=pl.Buffered(1))))
    except Exception:
        # Installed JAX rejected single-buffered pipeline_mode; use defaults.
        out_mat = run({})

    # (B, Cout, H*W) -> (B, 3, nc+5, H, W) -> permute(0,1,3,4,2),
    # exactly mirroring the PyTorch module's reshape/permute.
    # TODO(synk): keep the consumer in channel-major (B, Cout, H*W) layout (or
    # benchmark an in-kernel channel-last store) to avoid this full HBM
    # read+write transpose; kept here to match the module's output contract.
    y = out_mat.reshape(B, anchors_per_scale, num_classes + 5, H, W)
    return jnp.transpose(y, (0, 1, 3, 4, 2))


def make_params(key, in_channels, num_classes, anchors_per_scale=3):
    """Deterministic synthetic Conv+BN parameters with eval-mode BN folded
    into the conv:  w' = w * gamma/sqrt(var+eps) (per out-channel),
                    b' = beta - mean * gamma/sqrt(var+eps).
    Weight layout matches PyTorch conv weight (C_out, C_in); weights are cast
    to bf16 (native MXU dtype, half the weight DMA/VMEM), biases stay f32."""
    C1 = in_channels
    C2h = 2 * in_channels
    Cout = anchors_per_scale * (num_classes + 5)
    eps = 1e-5

    ks = jax.random.split(key, 10)
    w1 = jax.random.normal(ks[0], (C2h, C1), jnp.float32) * 0.1
    w2 = jax.random.normal(ks[1], (Cout, C2h), jnp.float32) * 0.1

    gamma1 = 1.0 + 0.1 * jax.random.normal(ks[2], (C2h,), jnp.float32)
    beta1 = 0.1 * jax.random.normal(ks[3], (C2h,), jnp.float32)
    mean1 = 0.1 * jax.random.normal(ks[4], (C2h,), jnp.float32)
    var1 = 1.0 + 0.1 * jax.random.uniform(ks[5], (C2h,), jnp.float32)

    gamma2 = 1.0 + 0.1 * jax.random.normal(ks[6], (Cout,), jnp.float32)
    beta2 = 0.1 * jax.random.normal(ks[7], (Cout,), jnp.float32)
    mean2 = 0.1 * jax.random.normal(ks[8], (Cout,), jnp.float32)
    var2 = 1.0 + 0.1 * jax.random.uniform(ks[9], (Cout,), jnp.float32)

    s1 = gamma1 / jnp.sqrt(var1 + eps)
    s2 = gamma2 / jnp.sqrt(var2 + eps)

    w1f = (w1 * s1[:, None]).astype(jnp.bfloat16)       # (C2h, C1)
    w2f = (w2 * s2[:, None]).astype(jnp.bfloat16)       # (Cout, C2h)
    b1 = (beta1 - mean1 * s1).reshape(C2h, 1).astype(jnp.float32)
    b2 = (beta2 - mean2 * s2).reshape(Cout, 1).astype(jnp.float32)
    return (w1f, b1, w2f, b2)


def _reference(x_nchw, params, num_classes, anchors_per_scale=3):
    """Plain-JAX (f32) reference mirroring the PyTorch forward with the same
    folded parameters."""
    w1, b1, w2, b2 = params
    w1 = w1.astype(jnp.float32)
    w2 = w2.astype(jnp.float32)
    B, C1, H, W = x_nchw.shape
    h = jnp.einsum("oc,bchw->bohw", w1, x_nchw) + b1.reshape(1, -1, 1, 1)
    h = h * jax.nn.sigmoid(h)
    y = jnp.einsum("oc,bchw->bohw", w2, h) + b2.reshape(1, -1, 1, 1)
    y = y.reshape(B, anchors_per_scale, num_classes + 5, H, W)
    return jnp.transpose(y, (0, 1, 3, 4, 2))


if __name__ == "__main__":
    B, C_in, H, W = 2, 4, 16, 16
    num_classes = 3
    anchors = 3

    key = jax.random.PRNGKey(0)
    kx, kp = jax.random.split(key)
    x = jax.random.normal(kx, (B, C_in, H, W), jnp.float32)
    params = make_params(kp, C_in, num_classes, anchors)

    out = jax.block_until_ready(
        scale_prediction(x, params, num_classes, anchors))
    assert out.shape == (B, anchors, H, W, num_classes + 5), out.shape

    ref = jax.block_until_ready(_reference(x, params, num_classes, anchors))
    # bf16 weights + in-kernel bf16 activation/SiLU -> small rounding error
    # vs. the f32 reference.
    assert jnp.allclose(out, ref, atol=2e-2, rtol=2e-2), \
        float(jnp.max(jnp.abs(out - ref)))

    print("KERNEL_OK")
</pallas_src>

<mosaic_0001>
module attributes {stable_mosaic.version = 11 : i64} {
  func.func @_scale_pred_kernel(%arg0: i32, %arg1: i32, %arg2: memref<1x4x256xf32, #tpu.memory_space<vmem>>, %arg3: memref<8x4xbf16, #tpu.memory_space<vmem>>, %arg4: memref<8x1xf32, #tpu.memory_space<vmem>>, %arg5: memref<24x8xbf16, #tpu.memory_space<vmem>>, %arg6: memref<24x1xf32, #tpu.memory_space<vmem>>, %arg7: memref<1x24x256xf32, #tpu.memory_space<vmem>>) attributes {dimension_semantics = [#tpu.dimension_semantics<parallel>, #tpu.dimension_semantics<parallel>], iteration_bounds = array<i64: 2, 1>, scalar_prefetch = 0 : i64, scratch_operands = 0 : i64, tpu.core_type = #tpu.core_type<tc>, window_params = [{transform_indices = @transform_0, window_bounds = array<i64: 1, 4, 256>}, {pipeline_mode = #tpu.pipeline_mode<synchronous>, transform_indices = @transform_1, window_bounds = array<i64: 8, 4>}, {pipeline_mode = #tpu.pipeline_mode<synchronous>, transform_indices = @transform_2, window_bounds = array<i64: 8, 1>}, {pipeline_mode = #tpu.pipeline_mode<synchronous>, transform_indices = @transform_3, window_bounds = array<i64: 24, 8>}, {pipeline_mode = #tpu.pipeline_mode<synchronous>, transform_indices = @transform_4, window_bounds = array<i64: 24, 1>}, {transform_indices = @transform_5, window_bounds = array<i64: 1, 24, 256>}]} {
    %c0 = arith.constant 0 : index
    %c0_0 = arith.constant 0 : index
    %c0_1 = arith.constant 0 : index
    %0 = vector.load %arg2[%c0, %c0_0, %c0_1] : memref<1x4x256xf32, #tpu.memory_space<vmem>>, vector<1x4x256xf32>
    %1 = vector.shape_cast %0 : vector<1x4x256xf32> to vector<4x256xf32>
    %2 = arith.truncf %1 : vector<4x256xf32> to vector<4x256xbf16>
    %c0_2 = arith.constant 0 : index
    %c0_3 = arith.constant 0 : index
    %3 = vector.load %arg3[%c0_2, %c0_3] : memref<8x4xbf16, #tpu.memory_space<vmem>>, vector<8x4xbf16>
    %cst = arith.constant dense<0.000000e+00> : vector<8x256xf32>
    %4 = tpu.matmul %3, %2, %cst {dimension_numbers = #tpu.dot_dimension_numbers<[1], [0], [0], [1], [0, 0, 1, 1], [], []>} : vector<8x4xbf16>, vector<4x256xbf16>, vector<8x256xf32> -> vector<8x256xf32>
    %c0_4 = arith.constant 0 : index
    %c0_5 = arith.constant 0 : index
    %5 = vector.load %arg4[%c0_4, %c0_5] : memref<8x1xf32, #tpu.memory_space<vmem>>, vector<8x1xf32>
    %6 = vector.broadcast %5 : vector<8x1xf32> to vector<8x256xf32>
    %7 = arith.addf %4, %6 : vector<8x256xf32>
    %8 = arith.truncf %7 : vector<8x256xf32> to vector<8x256xbf16>
    %9 = arith.negf %8 : vector<8x256xbf16>
    %10 = math.exp %9 : vector<8x256xbf16>
    %cst_6 = arith.constant 1.000000e+00 : bf16
    %11 = vector.broadcast %cst_6 : bf16 to vector<8x256xbf16>
    %12 = arith.addf %11, %10 : vector<8x256xbf16>
    %13 = arith.divf %11, %12 : vector<8x256xbf16>
    %14 = arith.mulf %8, %13 : vector<8x256xbf16>
    %c0_7 = arith.constant 0 : index
    %c0_8 = arith.constant 0 : index
    %15 = vector.load %arg5[%c0_7, %c0_8] : memref<24x8xbf16, #tpu.memory_space<vmem>>, vector<24x8xbf16>
    %cst_9 = arith.constant dense<0.000000e+00> : vector<24x256xf32>
    %16 = tpu.matmul %15, %14, %cst_9 {dimension_numbers = #tpu.dot_dimension_numbers<[1], [0], [0], [1], [0, 0, 1, 1], [], []>} : vector<24x8xbf16>, vector<8x256xbf16>, vector<24x256xf32> -> vector<24x256xf32>
    %c0_10 = arith.constant 0 : index
    %c0_11 = arith.constant 0 : index
    %17 = vector.load %arg6[%c0_10, %c0_11] : memref<24x1xf32, #tpu.memory_space<vmem>>, vector<24x1xf32>
    %18 = vector.broadcast %17 : vector<24x1xf32> to vector<24x256xf32>
    %19 = arith.addf %16, %18 : vector<24x256xf32>
    %c0_12 = arith.constant 0 : index
    %c0_13 = arith.constant 0 : index
    %c0_14 = arith.constant 0 : index
    %20 = vector.load %arg7[%c0_12, %c0_13, %c0_14] : memref<1x24x256xf32, #tpu.memory_space<vmem>>, vector<1x24x256xf32>
    %21 = vector.shape_cast %20 : vector<1x24x256xf32> to vector<24x256xf32>
    %22 = vector.shape_cast %19 : vector<24x256xf32> to vector<1x24x256xf32>
    tpu.vector_store %arg7[%c0_12, %c0_13, %c0_14], %22 {strides = array<i32>} : memref<1x24x256xf32, #tpu.memory_space<vmem>>, vector<1x24x256xf32>,
    return
  }
  func.func @transform_0(%arg0: i32, %arg1: i32) -> (i32, i32, i32) {
    %c0_i32 = arith.constant 0 : i32
    %c0_i32_0 = arith.constant 0 : i32
    return %arg0, %c0_i32, %arg1 : i32, i32, i32
  }
  func.func @transform_1(%arg0: i32, %arg1: i32) -> (i32, i32) {
    %c0_i32 = arith.constant 0 : i32
    %c0_i32_0 = arith.constant 0 : i32
    %c0_i32_1 = arith.constant 0 : i32
    return %c0_i32, %c0_i32_0 : i32, i32
  }
  func.func @transform_2(%arg0: i32, %arg1: i32) -> (i32, i32) {
    %c0_i32 = arith.constant 0 : i32
    %c0_i32_0 = arith.constant 0 : i32
    %c0_i32_1 = arith.constant 0 : i32
    return %c0_i32, %c0_i32_0 : i32, i32
  }
  func.func @transform_3(%arg0: i32, %arg1: i32) -> (i32, i32) {
    %c0_i32 = arith.constant 0 : i32
    %c0_i32_0 = arith.constant 0 : i32
    %c0_i32_1 = arith.constant 0 : i32
    return %c0_i32, %c0_i32_0 : i32, i32
  }
  func.func @transform_4(%arg0: i32, %arg1: i32) -> (i32, i32) {
    %c0_i32 = arith.constant 0 : i32
    %c0_i32_0 = arith.constant 0 : i32
    %c0_i32_1 = arith.constant 0 : i32
    return %c0_i32, %c0_i32_0 : i32, i32
  }
  func.func @transform_5(%arg0: i32, %arg1: i32) -> (i32, i32, i32) {
    %c0_i32 = arith.constant 0 : i32
    %c0_i32_0 = arith.constant 0 : i32
    return %arg0, %c0_i32, %arg1 : i32, i32, i32
  }
}

module attributes {stable_mosaic.version = 11 : i64} {
  func.func @_scale_pred_kernel(%arg0: i32, %arg1: i32, %arg2: memref<1x4x256xf32, #tpu.memory_space<vmem>>, %arg3: memref<8x4xbf16, #tpu.memory_space<vmem>>, %arg4: memref<8x1xf32, #tpu.memory_space<vmem>>, %arg5: memref<24x8xbf16, #tpu.memory_space<vmem>>, %arg6: memref<24x1xf32, #tpu.memory_space<vmem>>, %arg7: memref<1x24x256xf32, #tpu.memory_space<vmem>>) attributes {dimension_semantics = [#tpu.dimension_semantics<parallel>, #tpu.dimension_semantics<parallel>], iteration_bounds = array<i64: 2, 1>, scalar_prefetch = 0 : i64, scratch_operands = 0 : i64, tpu.core_type = #tpu.core_type<tc>, window_params = [{transform_indices = @transform_0, window_bounds = array<i64: 1, 4, 256>}, {pipeline_mode = #tpu.pipeline_mode<synchronous>, transform_indices = @transform_1, window_bounds = array<i64: 8, 4>}, {pipeline_mode = #tpu.pipeline_mode<synchronous>, transform_indices = @transform_2, window_bounds = array<i64: 8, 1>}, {pipeline_mode = #tpu.pipeline_mode<synchronous>, transform_indices = @transform_3, window_bounds = array<i64: 24, 8>}, {pipeline_mode = #tpu.pipeline_mode<synchronous>, transform_indices = @transform_4, window_bounds = array<i64: 24, 1>}, {transform_indices = @transform_5, window_bounds = array<i64: 1, 24, 256>}]} {
    %c0 = arith.constant 0 : index
    %c0_0 = arith.constant 0 : index
    %c0_1 = arith.constant 0 : index
    %0 = vector.load %arg2[%c0, %c0_0, %c0_1] : memref<1x4x256xf32, #tpu.memory_space<vmem>>, vector<1x4x256xf32>
    %1 = vector.shape_cast %0 : vector<1x4x256xf32> to vector<4x256xf32>
    %2 = arith.truncf %1 : vector<4x256xf32> to vector<4x256xbf16>
    %c0_2 = arith.constant 0 : index
    %c0_3 = arith.constant 0 : index
    %3 = vector.load %arg3[%c0_2, %c0_3] : memref<8x4xbf16, #tpu.memory_space<vmem>>, vector<8x4xbf16>
    %cst = arith.constant dense<0.000000e+00> : vector<8x256xf32>
    %4 = tpu.matmul %3, %2, %cst {dimension_numbers = #tpu.dot_dimension_numbers<[1], [0], [0], [1], [0, 0, 1, 1], [], []>} : vector<8x4xbf16>, vector<4x256xbf16>, vector<8x256xf32> -> vector<8x256xf32>
    %c0_4 = arith.constant 0 : index
    %c0_5 = arith.constant 0 : index
    %5 = vector.load %arg4[%c0_4, %c0_5] : memref<8x1xf32, #tpu.memory_space<vmem>>, vector<8x1xf32>
    %6 = vector.broadcast %5 : vector<8x1xf32> to vector<8x256xf32>
    %7 = arith.addf %4, %6 : vector<8x256xf32>
    %8 = arith.truncf %7 : vector<8x256xf32> to vector<8x256xbf16>
    %9 = arith.negf %8 : vector<8x256xbf16>
    %10 = math.exp %9 : vector<8x256xbf16>
    %cst_6 = arith.constant 1.000000e+00 : bf16
    %11 = vector.broadcast %cst_6 : bf16 to vector<8x256xbf16>
    %12 = arith.addf %11, %10 : vector<8x256xbf16>
    %13 = arith.divf %11, %12 : vector<8x256xbf16>
    %14 = arith.mulf %8, %13 : vector<8x256xbf16>
    %c0_7 = arith.constant 0 : index
    %c0_8 = arith.constant 0 : index
    %15 = vector.load %arg5[%c0_7, %c0_8] : memref<24x8xbf16, #tpu.memory_space<vmem>>, vector<24x8xbf16>
    %cst_9 = arith.constant dense<0.000000e+00> : vector<24x256xf32>
    %16 = tpu.matmul %15, %14, %cst_9 {dimension_numbers = #tpu.dot_dimension_numbers<[1], [0], [0], [1], [0, 0, 1, 1], [], []>} : vector<24x8xbf16>, vector<8x256xbf16>, vector<24x256xf32> -> vector<24x256xf32>
    %c0_10 = arith.constant 0 : index
    %c0_11 = arith.constant 0 : index
    %17 = vector.load %arg6[%c0_10, %c0_11] : memref<24x1xf32, #tpu.memory_space<vmem>>, vector<24x1xf32>
    %18 = vector.broadcast %17 : vector<24x1xf32> to vector<24x256xf32>
    %19 = arith.addf %16, %18 : vector<24x256xf32>
    %c0_12 = arith.constant 0 : index
    %c0_13 = arith.constant 0 : index
    %c0_14 = arith.constant 0 : index
    %20 = vector.load %arg7[%c0_12, %c0_13, %c0_14] : memref<1x24x256xf32, #tpu.memory_space<vmem>>, vector<1x24x256xf32>
    %21 = vector.shape_cast %20 : vector<1x24x256xf32> to vector<24x256xf32>
    %22 = vector.shape_cast %19 : vector<24x256xf32> to vector<1x24x256xf32>
    tpu.vector_store %arg7[%c0_12, %c0_13, %c0_14], %22 {strides = array<i32>} : memref<1x24x256xf32, #tpu.memory_space<vmem>>, vector<1x24x256xf32>,
    return
  }
  func.func @transform_0(%arg0: i32, %arg1: i32) -> (i32, i32, i32) {
    %c0_i32 = arith.constant 0 : i32
    %c0_i32_0 = arith.constant 0 : i32
    return %arg0, %c0_i32, %arg1 : i32, i32, i32
  }
  func.func @transform_1(%arg0: i32, %arg1: i32) -> (i32, i32) {
    %c0_i32 = arith.constant 0 : i32
    %c0_i32_0 = arith.constant 0 : i32
    %c0_i32_1 = arith.constant 0 : i32
    return %c0_i32, %c0_i32_0 : i32, i32
  }
  func.func @transform_2(%arg0: i32, %arg1: i32) -> (i32, i32) {
    %c0_i32 = arith.constant 0 : i32
    %c0_i32_0 = arith.constant 0 : i32
    %c0_i32_1 = arith.constant 0 : i32
    return %c0_i32, %c0_i32_0 : i32, i32
  }
  func.func @transform_3(%arg0: i32, %arg1: i32) -> (i32, i32) {
    %c0_i32 = arith.constant 0 : i32
    %c0_i32_0 = arith.constant 0 : i32
    %c0_i32_1 = arith.constant 0 : i32
    return %c0_i32, %c0_i32_0 : i32, i32
  }
  func.func @transform_4(%arg0: i32, %arg1: i32) -> (i32, i32) {
    %c0_i32 = arith.constant 0 : i32
    %c0_i32_0 = arith.constant 0 : i32
    %c0_i32_1 = arith.constant 0 : i32
    return %c0_i32, %c0_i32_0 : i32, i32
  }
  func.func @transform_5(%arg0: i32, %arg1: i32) -> (i32, i32, i32) {
    %c0_i32 = arith.constant 0 : i32
    %c0_i32_0 = arith.constant 0 : i32
    return %arg0, %c0_i32, %arg1 : i32, i32, i32
  }
}

</mosaic_0001>

<bundles_post_ra>
// kernel: tpu_custom_call.1
= control target key start
LH: loop header
LB: loop body
LE: loop exit
PB: predicated region body
PF: predicated region fallthrough
CT: control target
= control target key end

     0   :  { %10 = vsyncpa [#allocation3], 0  ;;  %s851_s0 = inlined_call_operand.vmem [shape: f32[2,4,256], index: 0, kind: input, shape index: {}]   ;;  %s852_s1 = inlined_call_operand.vmem [shape: bf16[8,4], index: 1, kind: input, shape index: {}]   ;;  %s853_s2 = inlined_call_operand.vmem [shape: f32[8,1], index: 2, kind: input, shape index: {}]   ;;  %s854_s3 = inlined_call_operand.vmem [shape: bf16[24,8], index: 3, kind: input, shape index: {}]   ;;  %s855_s4 = inlined_call_operand.vmem [shape: f32[24,1], index: 4, kind: input, shape index: {}]   ;;  %s856_s5 = inlined_call_operand.hbm [shape: f32[2,24,256], index: 5, kind: output, shape index: {}]  }
   0x1   :  { %12 = vsyncpa [#allocation3 + $0x1], 0  ;;  %s729_s18 = smov 0   ;;  %s731_s19 = smov 0  }
   0x2   :  { %s733_s20 = smov 0   ;;  %s735_s21 = smov 0  }
   0x3   :  { %s737_s22 = smov 0   ;;  %s739_s23 = smov 0  }
   0x4 LB: > { %s522_s24 = sadd.s32 4294967295, %s693_s23   ;;  %s523_s25 = sadd.s32 4294967294, %s693_s23   ;;  %s693_s23 = sphi %s739_s23, %s18_s23   ;;  %s689_s22 = sphi %s737_s22, %s863_s22   ;;  %s685_s21 = sphi %s735_s21, %s862_s21   ;;  %s681_s20 = sphi %s733_s20, %s861_s20   ;;  %s677_s19 = sphi %s731_s19, %s860_s19   ;;  %s673_s18 = sphi %s729_s18, %s859_s18  }
   0x5   : > { %s30_s26 = sadd.s32 1, %s689_s22  ;;  %s151_s27 = sadd.s32 1, %s681_s20 }
   0x6   : > { %p32_p0 = scmp.ge.s32.totalorder %s30_s26, 2  ;;  %p161_p1 = scmp.ne.s32.totalorder %s681_s20, %s677_s19 }
   0x7   : > { %p162_p2 = scmp.eq.s32.totalorder %s522_s24, 1  ;;  %p167_p3 = scmp.ne.s32.totalorder %s677_s19, %s673_s18 }
   0x8   : > { %s865_s26 = smov (%p32_p0, %s30_s26), 0  ;;  %p168_p5 = scmp.eq.s32.totalorder %s523_s25, 1 }
   0x9   : > { %p769_p4 = por %p162_p2, %p161_p1  ;;  %s146_s29 = ssub.s32 %s689_s22, %s865_s26 }
   0xa   : > { %p526_p6 = scmp.ge.s32.totalorder %s693_s23, 1  ;;  %p149_p7 = scmp.eq.s32.totalorder %s146_s29, 0 }
   0xb   : > { %p776_p8 = por %p168_p5, %p167_p3  ;;  %p211_p9 = scmp.lt.s32.totalorder %s693_s23, 3 }
   0xc   : > { %s782_s6 = scalar_select %p149_p7, %s681_s20, %s151_s27  }
   0xd   : > { %p212_p10 = pnand %p526_p6, %p211_p9 }
   0xe   : > { %p244_p11 = scmp.lt.s32.totalorder (!%p212_p10), %s685_s21, 1  ;;  %s240_s11 = sand.u32 (!%p212_p10), 1, %s677_s19  }
   0xf   : > { %215 = sbr.rel (%p212_p10) target bundleno = 371 (0x173), region = 40 }
  0x10   : > { %s544_s12 = smul.u32 (!%p212_p10), 48, %s240_s11 }
  0x11   : > { %s545_s14 = smul.u32 (!%p212_p10), 48, %s685_s21 }
  0x13   : > { %s439_s17 = scalar_lea.hbm (!%p212_p10), %s856_s5, %s545_s14 }
  0x14   : > { %v695_v0 = vmov 0   ;;  %v266_v1 = vld [vmem:[%s853_s2] sm:$0xff]  ;;  %s245_s9 = scalar_select %p244_p11, %s685_s21, 1  ;;  %vm276_vm0 = vcmask 1041408   ;;  %vm272_vm1 = vcmask 31744   ;;  %v344_v38 = vld [vmem:[%s855_s4 + $0x8] sm:$0xff] }
  0x15   : > { %605 = vset.pattern.permute.xlu0 %v695_v0  ;;  %606 = vset.pattern.permute.xlu1 %v695_v0  ;;  %v343_v3 = vld [vmem:[%s855_s4] sm:$0xff]  ;;  %v696_v34 = vmov 1065369472   ;;  %v345_v47 = vld [vmem:[%s855_s4 + $0x10] sm:$0xff]  ;;  %vm376_vm2 = vcmask 1043456   ;;  %vm369_vm3 = vcmask 64512  }
  0x16   : > { %269 = vperm.xlu0 %605, %v266_v1   ;;  %s542_s10 = sshll.u32 %s245_s9, 3  ;;  %v265_v10 = vld [vmem:[%s852_s1] sm:$0xf]  ;;  %v323_v35 = vunpack.c.h.bf16 %v696_v34  ;;  %v324_v36 = vunpack.c.l.bf16 %v696_v34  ;;  %353 = vperm.xlu1 %606, %v344_v38   ;;  %v342_v55 = vld [vmem:[%s854_s3 + $0x8] sm:$0xf]  ;;  %s442_s25 = sshll.u32 %s439_s17, 4  ;;  %s443_s25 = int_to_ptr.hbm [resolvable:$true] %s442_s25 }
  0x17   : > { %s251_s13 = scalar_lea.vmem %s851_s0, %s542_s10  ;;  %v543_v54 = vld [vmem:[%s854_s3] sm:$0xff]  ;;  %v366_v56 = vunpack.c.l.b16 %v342_v55  ;;  %s426_s21 = scalar_lea.sflag [#allocation3], %s240_s11 }
  0x18   : > { %v256_v2 = vld [vmem:[%s251_s13] sm:$0xff]  ;;  %s242_s13 = scalar_lea.vmem [#allocation2], %s544_s12  ;;  %s629_s27 = sshra.s32 %s443_s25, 4  ;;  %s630_s27 = int_to_ptr.hbm [resolvable:$true] %s629_s27 }
  0x19   : > { %258 = vst [vmem:[#allocation1] ss:$2 sm:$0xff] %v256_v2  ;;  %v368_v57 = vpack.c.b16 %v366_v56, %v366_v56  ;;  %s440_s24 = sshll.u32 %s242_s13, 4  ;;  %s631_s29 = scalar_lea.hbm %s630_s27, 48  ;;  %s441_s24 = int_to_ptr.vmem [resolvable:$true] %s440_s24 }
  0x1a   : > { %p632_p12 = scmp.ne.s32.totalorder %s630_s27, %s631_s29  ;;  %s635_s9 = scalar_lea.hbm %s856_s5, 96 }
  0x1b   : > { %p636_p1 = scmp.lt.s32.totalorder %s630_s27, %s856_s5  ;;  %p637_p2 = scmp.lt.s32.totalorder %s635_s9, %s631_s29 }
  0x1c   : > { %p633_p13 = pnand %p632_p12, %p769_p4 }
  0x1d   : > { %p638_p3 = por %p637_p2, %p636_p1 }
  0x1e   : > { %348 = vperm.xlu0 %605, %v343_v3   ;;  %358 = vperm.xlu1 %606, %v345_v47   ;;  %p634_p0 = pneg %p633_p13 }
  0x20   : > { %v259_v4 = vld.sshfl [vmem:[#allocation1] sm:$0xff pattern:$0x75316420]  ;;  %v260_v5 = vld.sshfl [vmem:[#allocation1 + $0x8] sm:$0xff pattern:$0x75316420]  ;;  %p639_p5 = pnand %p638_p3, %p634_p0 }
  0x21   : > { %v263_v6 = vpack.c.bf16 %v259_v4, %v259_v4  ;;  %v264_v7 = vpack.c.bf16 %v260_v5, %v260_v5 }
  0x23   : > { %v278_v8 = vsel %vm276_vm0, %v263_v6, 0  ;;  %v281_v9 = vsel %vm276_vm0, %v264_v7, 0 }
  0x24   : > { %290 = vmatpush.bf16.msra.mxu0 %v278_v8  ;;  %303 = vmatpush.bf16.msra.mxu1 %v281_v9 }
  0x27   : > { %529 = vmatmul.msk.bf16.vlgmr.msra.gmra.mxu0 %vm272_vm1, %v265_v10  ;;  %530 = vmatmul.msk.bf16.vlgmr.msra.gmra.mxu1 %vm272_vm1, %v265_v10 }
  0x88   : > { %v270_v11 = vpop.permute.xlu0 %269  ;;  %v354_v63 = vpop.permute.xlu1 %353 }
  0x90   : > { %v349_v58 = vpop.permute.xlu0 %348  ;;  %v359_v4 = vpop.permute.xlu1 %358 }
  0xa4   : > { %v292_v12 = vpop.f32.mrf.mxu0  ;;  %v305_v13 = vpop.f32.mrf.mxu1 }
  0xa5   : > { %v293_v14 = vadd.f32 %v292_v12, %v270_v11  ;;  %v306_v15 = vadd.f32 %v305_v13, %v270_v11 }
  0xa7   : > { %v309_v16 = vpack.c.bf16 %v306_v15, %v293_v14 }
  0xa9   : > { %v310_v17 = vxor.u32 2147516416, %v309_v16  ;;  %v332_v43 = vunpack.c.l.bf16 %v309_v16  ;;  %v333_v45 = vunpack.c.h.bf16 %v309_v16 }
  0xab   : > { %v311_v18 = vunpack.c.l.bf16 %v310_v17  ;;  %v312_v19 = vunpack.c.h.bf16 %v310_v17 }
  0xac   : > { %v294_v20 = vpop.f32.mrf.mxu0  ;;  %v307_v21 = vpop.f32.mrf.mxu1 }
  0xad   : > { %v313_v22 = vmul.f32 1.442695, %v311_v18  ;;  %v315_v23 = vmul.f32 1.442695, %v312_v19 }
  0xaf   : > { %607 = vpow2.f32 %v313_v22 }
  0xb0   : > { %609 = vpow2.f32 %v315_v23 }
  0xb5   : > { %v608_v24 = vpop.eup %607 }
  0xb6   : > { %v610_v25 = vpop.eup %609 }
  0xb7   : > { %v317_v26 = vpack.c.bf16 %v610_v25, %v608_v24 }
  0xb9   : > { %v318_v27 = vunpack.c.l.bf16 %v317_v26  ;;  %v319_v28 = vunpack.c.h.bf16 %v317_v26 }
  0xbb   : > { %v320_v29 = vadd.f32 1.0, %v318_v27  ;;  %v321_v30 = vadd.f32 1.0, %v319_v28 }
  0xbd   : > { %v322_v31 = vpack.c.bf16 %v321_v30, %v320_v29 }
  0xbf   : > { %v325_v32 = vunpack.c.h.bf16 %v322_v31  ;;  %v326_v33 = vunpack.c.l.bf16 %v322_v31 }
  0xc1   : > { %611 = vrcp.f32 %v325_v32 }
  0xc2   : > { %613 = vrcp.f32 %v326_v33 }
  0xc7   : > { %v612_v37 = vpop.eup %611 }
  0xc8   : > { %v614_v39 = vpop.eup %613  ;;  %v328_v40 = vmul.f32 %v612_v37, %v323_v35 }
  0xc9   : > { %v330_v41 = vmul.f32 %v614_v39, %v324_v36 }
  0xcb   : > { %v331_v42 = vpack.c.bf16 %v328_v40, %v330_v41 }
  0xcd   : > { %v334_v44 = vunpack.c.l.bf16 %v331_v42  ;;  %v335_v46 = vunpack.c.h.bf16 %v331_v42 }
  0xcf   : > { %v336_v48 = vmul.f32 %v334_v44, %v332_v43  ;;  %v337_v49 = vmul.f32 %v335_v46, %v333_v45 }
  0xd1   : > { %v338_v50 = vpack.c.bf16 %v336_v48, %v336_v48  ;;  %v339_v51 = vpack.c.bf16 %v337_v49, %v337_v49 }
  0xd3   : > { %v378_v52 = vsel %vm376_vm2, %v338_v50, 0  ;;  %v381_v53 = vsel %vm376_vm2, %v339_v51, 0 }
  0xd4   : > { %390 = vmatpush.bf16.msra.mxu2 %v378_v52  ;;  %408 = vmatpush.bf16.msra.mxu3 %v381_v53 }
  0xd7   : > { %535 = vmatmul.msk.bf16.vlgmr.msra.gmra.mxu2 %vm369_vm3, %v543_v54  ;;  %537 = vmatmul.msk.bf16.vlgmr.msra.gmra.mxu3 %vm369_vm3, %v543_v54 }
  0xe7   : > { %536 = vmatmul.msk.bf16.gmra.mxu2 %vm369_vm3, %v368_v57  ;;  %538 = vmatmul.msk.bf16.gmra.mxu3 %vm369_vm3, %v368_v57 }
 0x15a   : > { %v392_v59 = vpop.f32.mrf.mxu2  ;;  %v410_v60 = vpop.f32.mrf.mxu3 }
 0x15b   : > { %v393_v61 = vadd.f32 %v392_v59, %v349_v58  ;;  %v411_v62 = vadd.f32 %v410_v60, %v349_v58 }
 0x15d   : > { %419 = vst [vmem:[%s242_s13] sm:$0xff] %v393_v61 }
 0x15e   : > { %420 = vst [vmem:[%s242_s13 + $0x8] sm:$0xff] %v411_v62 }
 0x162   : > { %v394_v0 = vpop.f32.mrf.mxu2  ;;  %v412_v1 = vpop.f32.mrf.mxu3 }
 0x163   : > { %v395_v2 = vadd.f32 %v394_v0, %v354_v63  ;;  %v413_v3 = vadd.f32 %v412_v1, %v354_v63 }
 0x165   : > { %421 = vst [vmem:[%s242_s13 + $0x10] sm:$0xff] %v395_v2 }
 0x166   : > { %422 = vst [vmem:[%s242_s13 + $0x18] sm:$0xff] %v413_v3 }
 0x16a   : > { %v397_v5 = vpop.f32.mrf.mxu2  ;;  %v415_v6 = vpop.f32.mrf.mxu3 }
 0x16b   : > { %v398_v7 = vadd.f32 %v397_v5, %v359_v4  ;;  %v416_v8 = vadd.f32 %v415_v6, %v359_v4 }
 0x16d   : > { %423 = vst [vmem:[%s242_s13 + $0x20] sm:$0xff] %v398_v7 }
 0x16e   : > { %424 = vst [vmem:[%s242_s13 + $0x28] sm:$0xff] %v416_v8 }
 0x16f   : > { %642 = shalt.err (!%p639_p5)
}
 0x170   : > { %s697_s11 = smov 256   ;;  %s698_s13 = smov 16  }
 0x171   : > { %546 = dma.vmem_to_hbm [thread:$0]  (%p769_p4), %s441_s24, 768, %s443_s25, %s426_s21, %s697_s11, %s697_s11, %s698_s13  }
 0x172   : > { %v399_v9 = vpop.f32.mrf.mxu2  ;;  %v417_v10 = vpop.f32.mrf.mxu3 }
 0x173 PF: > { %p552_p6 = scmp.ge.s32.totalorder %s693_s23, 2  ;;  %s457_s14 = sand.u32 1, %s673_s18  }
 0x174   : > { %s458_s15 = scalar_lea.sflag [#allocation3], %s457_s14 }
 0x175   : > { %p549_p7 = pnand %p552_p6, %p776_p8 }
 0x177   : > { %p550_p9 = pneg %p549_p7 }
 0x179   : > { %668 = dma.done.wait (%p550_p9), %s458_s15, 768  }
 0x17a   : > { %670 = vsyncadd (%p550_p9), %s458_s15, 4294966528  ;;  %s18_s23 = sadd.s32 1, %s693_s23   ;;  %s859_s18 = smov %s677_s19 }
 0x17b   : > { %p15_p10 = scmp.ge.s32.totalorder %s18_s23, 4   ;;  %s860_s19 = smov %s681_s20 }
 0x17c   : > { %s861_s20 = smov %s782_s6  ;;  %s862_s21 = smov %s689_s22 }
 0x17d   : > { %s863_s22 = smov %s865_s26  ;;  %17 = sbr.rel (!%p15_p10) target bundleno = 4 (0x4), region = 75 }
 0x182   :  { %464 = vsyncpa [#allocation3], 1 }
 0x183   :  { %466 = vsyncpa [#allocation3 + $0x1], 1 }

// kernel: tpu_custom_call.1
= control target key start
LH: loop header
LB: loop body
LE: loop exit
PB: predicated region body
PF: predicated region fallthrough
CT: control target
= control target key end

     0   :  { %10 = vsyncpa [#allocation3], 0  ;;  %s851_s0 = inlined_call_operand.vmem [shape: f32[2,4,256], index: 0, kind: input, shape index: {}]   ;;  %s852_s1 = inlined_call_operand.vmem [shape: bf16[8,4], index: 1, kind: input, shape index: {}]   ;;  %s853_s2 = inlined_call_operand.vmem [shape: f32[8,1], index: 2, kind: input, shape index: {}]   ;;  %s854_s3 = inlined_call_operand.vmem [shape: bf16[24,8], index: 3, kind: input, shape index: {}]   ;;  %s855_s4 = inlined_call_operand.vmem [shape: f32[24,1], index: 4, kind: input, shape index: {}]   ;;  %s856_s5 = inlined_call_operand.hbm [shape: f32[2,24,256], index: 5, kind: output, shape index: {}]  }
   0x1   :  { %12 = vsyncpa [#allocation3 + $0x1], 0  ;;  %s729_s18 = smov 0   ;;  %s731_s19 = smov 0  }
   0x2   :  { %s733_s20 = smov 0   ;;  %s735_s21 = smov 0  }
   0x3   :  { %s737_s22 = smov 0   ;;  %s739_s23 = smov 0  }
   0x4 LB: > { %s522_s24 = sadd.s32 4294967295, %s693_s23   ;;  %s523_s25 = sadd.s32 4294967294, %s693_s23   ;;  %s693_s23 = sphi %s739_s23, %s18_s23   ;;  %s689_s22 = sphi %s737_s22, %s863_s22   ;;  %s685_s21 = sphi %s735_s21, %s862_s21   ;;  %s681_s20 = sphi %s733_s20, %s861_s20   ;;  %s677_s19 = sphi %s731_s19, %s860_s19   ;;  %s673_s18 = sphi %s729_s18, %s859_s18  }
   0x5   : > { %s30_s26 = sadd.s32 1, %s689_s22  ;;  %s151_s27 = sadd.s32 1, %s681_s20 }
   0x6   : > { %p32_p0 = scmp.ge.s32.totalorder %s30_s26, 2  ;;  %p161_p1 = scmp.ne.s32.totalorder %s681_s20, %s677_s19 }
   0x7   : > { %p162_p2 = scmp.eq.s32.totalorder %s522_s24, 1  ;;  %p167_p3 = scmp.ne.s32.totalorder %s677_s19, %s673_s18 }
   0x8   : > { %s865_s26 = smov (%p32_p0, %s30_s26), 0  ;;  %p168_p5 = scmp.eq.s32.totalorder %s523_s25, 1 }
   0x9   : > { %p769_p4 = por %p162_p2, %p161_p1  ;;  %s146_s29 = ssub.s32 %s689_s22, %s865_s26 }
   0xa   : > { %p526_p6 = scmp.ge.s32.totalorder %s693_s23, 1  ;;  %p149_p7 = scmp.eq.s32.totalorder %s146_s29, 0 }
   0xb   : > { %p776_p8 = por %p168_p5, %p167_p3  ;;  %p211_p9 = scmp.lt.s32.totalorder %s693_s23, 3 }
   0xc   : > { %s782_s6 = scalar_select %p149_p7, %s681_s20, %s151_s27  }
   0xd   : > { %p212_p10 = pnand %p526_p6, %p211_p9 }
   0xe   : > { %p244_p11 = scmp.lt.s32.totalorder (!%p212_p10), %s685_s21, 1  ;;  %s240_s11 = sand.u32 (!%p212_p10), 1, %s677_s19  }
   0xf   : > { %215 = sbr.rel (%p212_p10) target bundleno = 371 (0x173), region = 40 }
  0x10   : > { %s544_s12 = smul.u32 (!%p212_p10), 48, %s240_s11 }
  0x11   : > { %s545_s14 = smul.u32 (!%p212_p10), 48, %s685_s21 }
  0x13   : > { %s439_s17 = scalar_lea.hbm (!%p212_p10), %s856_s5, %s545_s14 }
  0x14   : > { %v695_v0 = vmov 0   ;;  %v266_v1 = vld [vmem:[%s853_s2] sm:$0xff]  ;;  %s245_s9 = scalar_select %p244_p11, %s685_s21, 1  ;;  %vm276_vm0 = vcmask 1041408   ;;  %vm272_vm1 = vcmask 31744   ;;  %v344_v38 = vld [vmem:[%s855_s4 + $0x8] sm:$0xff] }
  0x15   : > { %605 = vset.pattern.permute.xlu0 %v695_v0  ;;  %606 = vset.pattern.permute.xlu1 %v695_v0  ;;  %v343_v3 = vld [vmem:[%s855_s4] sm:$0xff]  ;;  %v696_v34 = vmov 1065369472   ;;  %v345_v47 = vld [vmem:[%s855_s4 + $0x10] sm:$0xff]  ;;  %vm376_vm2 = vcmask 1043456   ;;  %vm369_vm3 = vcmask 64512  }
  0x16   : > { %269 = vperm.xlu0 %605, %v266_v1   ;;  %s542_s10 = sshll.u32 %s245_s9, 3  ;;  %v265_v10 = vld [vmem:[%s852_s1] sm:$0xf]  ;;  %v323_v35 = vunpack.c.h.bf16 %v696_v34  ;;  %v324_v36 = vunpack.c.l.bf16 %v696_v34  ;;  %353 = vperm.xlu1 %606, %v344_v38   ;;  %v342_v55 = vld [vmem:[%s854_s3 + $0x8] sm:$0xf]  ;;  %s442_s25 = sshll.u32 %s439_s17, 4  ;;  %s443_s25 = int_to_ptr.hbm [resolvable:$true] %s442_s25 }
  0x17   : > { %s251_s13 = scalar_lea.vmem %s851_s0, %s542_s10  ;;  %v543_v54 = vld [vmem:[%s854_s3] sm:$0xff]  ;;  %v366_v56 = vunpack.c.l.b16 %v342_v55  ;;  %s426_s21 = scalar_lea.sflag [#allocation3], %s240_s11 }
  0x18   : > { %v256_v2 = vld [vmem:[%s251_s13] sm:$0xff]  ;;  %s242_s13 = scalar_lea.vmem [#allocation2], %s544_s12  ;;  %s629_s27 = sshra.s32 %s443_s25, 4  ;;  %s630_s27 = int_to_ptr.hbm [resolvable:$true] %s629_s27 }
  0x19   : > { %258 = vst [vmem:[#allocation1] ss:$2 sm:$0xff] %v256_v2  ;;  %v368_v57 = vpack.c.b16 %v366_v56, %v366_v56  ;;  %s440_s24 = sshll.u32 %s242_s13, 4  ;;  %s631_s29 = scalar_lea.hbm %s630_s27, 48  ;;  %s441_s24 = int_to_ptr.vmem [resolvable:$true] %s440_s24 }
  0x1a   : > { %p632_p12 = scmp.ne.s32.totalorder %s630_s27, %s631_s29  ;;  %s635_s9 = scalar_lea.hbm %s856_s5, 96 }
  0x1b   : > { %p636_p1 = scmp.lt.s32.totalorder %s630_s27, %s856_s5  ;;  %p637_p2 = scmp.lt.s32.totalorder %s635_s9, %s631_s29 }
  0x1c   : > { %p633_p13 = pnand %p632_p12, %p769_p4 }
  0x1d   : > { %p638_p3 = por %p637_p2, %p636_p1 }
  0x1e   : > { %348 = vperm.xlu0 %605, %v343_v3   ;;  %358 = vperm.xlu1 %606, %v345_v47   ;;  %p634_p0 = pneg %p633_p13 }
  0x20   : > { %v259_v4 = vld.sshfl [vmem:[#allocation1] sm:$0xff pattern:$0x75316420]  ;;  %v260_v5 = vld.sshfl [vmem:[#allocation1 + $0x8] sm:$0xff pattern:$0x75316420]  ;;  %p639_p5 = pnand %p638_p3, %p634_p0 }
  0x21   : > { %v263_v6 = vpack.c.bf16 %v259_v4, %v259_v4  ;;  %v264_v7 = vpack.c.bf16 %v260_v5, %v260_v5 }
  0x23   : > { %v278_v8 = vsel %vm276_vm0, %v263_v6, 0  ;;  %v281_v9 = vsel %vm276_vm0, %v264_v7, 0 }
  0x24   : > { %290 = vmatpush.bf16.msra.mxu0 %v278_v8  ;;  %303 = vmatpush.bf16.msra.mxu1 %v281_v9 }
  0x27   : > { %529 = vmatmul.msk.bf16.vlgmr.msra.gmra.mxu0 %vm272_vm1, %v265_v10  ;;  %530 = vmatmul.msk.bf16.vlgmr.msra.gmra.mxu1 %vm272_vm1, %v265_v10 }
  0x88   : > { %v270_v11 = vpop.permute.xlu0 %269  ;;  %v354_v63 = vpop.permute.xlu1 %353 }
  0x90   : > { %v349_v58 = vpop.permute.xlu0 %348  ;;  %v359_v4 = vpop.permute.xlu1 %358 }
  0xa4   : > { %v292_v12 = vpop.f32.mrf.mxu0  ;;  %v305_v13 = vpop.f32.mrf.mxu1 }
  0xa5   : > { %v293_v14 = vadd.f32 %v292_v12, %v270_v11  ;;  %v306_v15 = vadd.f32 %v305_v13, %v270_v11 }
  0xa7   : > { %v309_v16 = vpack.c.bf16 %v306_v15, %v293_v14 }
  0xa9   : > { %v310_v17 = vxor.u32 2147516416, %v309_v16  ;;  %v332_v43 = vunpack.c.l.bf16 %v309_v16  ;;  %v333_v45 = vunpack.c.h.bf16 %v309_v16 }
  0xab   : > { %v311_v18 = vunpack.c.l.bf16 %v310_v17  ;;  %v312_v19 = vunpack.c.h.bf16 %v310_v17 }
  0xac   : > { %v294_v20 = vpop.f32.mrf.mxu0  ;;  %v307_v21 = vpop.f32.mrf.mxu1 }
  0xad   : > { %v313_v22 = vmul.f32 1.442695, %v311_v18  ;;  %v315_v23 = vmul.f32 1.442695, %v312_v19 }
  0xaf   : > { %607 = vpow2.f32 %v313_v22 }
  0xb0   : > { %609 = vpow2.f32 %v315_v23 }
  0xb5   : > { %v608_v24 = vpop.eup %607 }
  0xb6   : > { %v610_v25 = vpop.eup %609 }
  0xb7   : > { %v317_v26 = vpack.c.bf16 %v610_v25, %v608_v24 }
  0xb9   : > { %v318_v27 = vunpack.c.l.bf16 %v317_v26  ;;  %v319_v28 = vunpack.c.h.bf16 %v317_v26 }
  0xbb   : > { %v320_v29 = vadd.f32 1.0, %v318_v27  ;;  %v321_v30 = vadd.f32 1.0, %v319_v28 }
  0xbd   : > { %v322_v31 = vpack.c.bf16 %v321_v30, %v320_v29 }
  0xbf   : > { %v325_v32 = vunpack.c.h.bf16 %v322_v31  ;;  %v326_v33 = vunpack.c.l.bf16 %v322_v31 }
  0xc1   : > { %611 = vrcp.f32 %v325_v32 }
  0xc2   : > { %613 = vrcp.f32 %v326_v33 }
  0xc7   : > { %v612_v37 = vpop.eup %611 }
  0xc8   : > { %v614_v39 = vpop.eup %613  ;;  %v328_v40 = vmul.f32 %v612_v37, %v323_v35 }
  0xc9   : > { %v330_v41 = vmul.f32 %v614_v39, %v324_v36 }
  0xcb   : > { %v331_v42 = vpack.c.bf16 %v328_v40, %v330_v41 }
  0xcd   : > { %v334_v44 = vunpack.c.l.bf16 %v331_v42  ;;  %v335_v46 = vunpack.c.h.bf16 %v331_v42 }
  0xcf   : > { %v336_v48 = vmul.f32 %v334_v44, %v332_v43  ;;  %v337_v49 = vmul.f32 %v335_v46, %v333_v45 }
  0xd1   : > { %v338_v50 = vpack.c.bf16 %v336_v48, %v336_v48  ;;  %v339_v51 = vpack.c.bf16 %v337_v49, %v337_v49 }
  0xd3   : > { %v378_v52 = vsel %vm376_vm2, %v338_v50, 0  ;;  %v381_v53 = vsel %vm376_vm2, %v339_v51, 0 }
  0xd4   : > { %390 = vmatpush.bf16.msra.mxu2 %v378_v52  ;;  %408 = vmatpush.bf16.msra.mxu3 %v381_v53 }
  0xd7   : > { %535 = vmatmul.msk.bf16.vlgmr.msra.gmra.mxu2 %vm369_vm3, %v543_v54  ;;  %537 = vmatmul.msk.bf16.vlgmr.msra.gmra.mxu3 %vm369_vm3, %v543_v54 }
  0xe7   : > { %536 = vmatmul.msk.bf16.gmra.mxu2 %vm369_vm3, %v368_v57  ;;  %538 = vmatmul.msk.bf16.gmra.mxu3 %vm369_vm3, %v368_v57 }
 0x15a   : > { %v392_v59 = vpop.f32.mrf.mxu2  ;;  %v410_v60 = vpop.f32.mrf.mxu3 }
 0x15b   : > { %v393_v61 = vadd.f32 %v392_v59, %v349_v58  ;;  %v411_v62 = vadd.f32 %v410_v60, %v349_v58 }
 0x15d   : > { %419 = vst [vmem:[%s242_s13] sm:$0xff] %v393_v61 }
 0x15e   : > { %420 = vst [vmem:[%s242_s13 + $0x8] sm:$0xff] %v411_v62 }
 0x162   : > { %v394_v0 = vpop.f32.mrf.mxu2  ;;  %v412_v1 = vpop.f32.mrf.mxu3 }
 0x163   : > { %v395_v2 = vadd.f32 %v394_v0, %v354_v63  ;;  %v413_v3 = vadd.f32 %v412_v1, %v354_v63 }
 0x165   : > { %421 = vst [vmem:[%s242_s13 + $0x10] sm:$0xff] %v395_v2 }
 0x166   : > { %422 = vst [vmem:[%s242_s13 + $0x18] sm:$0xff] %v413_v3 }
 0x16a   : > { %v397_v5 = vpop.f32.mrf.mxu2  ;;  %v415_v6 = vpop.f32.mrf.mxu3 }
 0x16b   : > { %v398_v7 = vadd.f32 %v397_v5, %v359_v4  ;;  %v416_v8 = vadd.f32 %v415_v6, %v359_v4 }
 0x16d   : > { %423 = vst [vmem:[%s242_s13 + $0x20] sm:$0xff] %v398_v7 }
 0x16e   : > { %424 = vst [vmem:[%s242_s13 + $0x28] sm:$0xff] %v416_v8 }
 0x16f   : > { %642 = shalt.err (!%p639_p5)
}
 0x170   : > { %s697_s11 = smov 256   ;;  %s698_s13 = smov 16  }
 0x171   : > { %546 = dma.vmem_to_hbm [thread:$0]  (%p769_p4), %s441_s24, 768, %s443_s25, %s426_s21, %s697_s11, %s697_s11, %s698_s13  }
 0x172   : > { %v399_v9 = vpop.f32.mrf.mxu2  ;;  %v417_v10 = vpop.f32.mrf.mxu3 }
 0x173 PF: > { %p552_p6 = scmp.ge.s32.totalorder %s693_s23, 2  ;;  %s457_s14 = sand.u32 1, %s673_s18  }
 0x174   : > { %s458_s15 = scalar_lea.sflag [#allocation3], %s457_s14 }
 0x175   : > { %p549_p7 = pnand %p552_p6, %p776_p8 }
 0x177   : > { %p550_p9 = pneg %p549_p7 }
 0x179   : > { %668 = dma.done.wait (%p550_p9), %s458_s15, 768  }
 0x17a   : > { %670 = vsyncadd (%p550_p9), %s458_s15, 4294966528  ;;  %s18_s23 = sadd.s32 1, %s693_s23   ;;  %s859_s18 = smov %s677_s19 }
 0x17b   : > { %p15_p10 = scmp.ge.s32.totalorder %s18_s23, 4   ;;  %s860_s19 = smov %s681_s20 }
 0x17c   : > { %s861_s20 = smov %s782_s6  ;;  %s862_s21 = smov %s689_s22 }
 0x17d   : > { %s863_s22 = smov %s865_s26  ;;  %17 = sbr.rel (!%p15_p10) target bundleno = 4 (0x4), region = 75 }
 0x182   :  { %464 = vsyncpa [#allocation3], 1 }
 0x183   :  { %466 = vsyncpa [#allocation3 + $0x1], 1 }

</bundles_post_ra>
